<compile_context>
chip_gen: v5e
topology: v5e:2x2
jax: 0.10.0
libtpu: 0.0.40
codegen_flags: <defaults>
</compile_context>

<pallas_src>
import jax
import jax.numpy as jnp
from jax.experimental import pallas as pl
from jax.experimental.pallas import tpu as pltpu

C_HALF = 256     # channels of each of x_global / c (concat => 512)
C_H1 = 128
C_H2 = 64
C_H3 = 32


def _round_up(x, m):
    return ((x + m - 1) // m) * m


def _globalinfo_kernel(xg_ref, c_ref, w1a_ref, w1b_ref, w2_ref, w3_ref,
                       wl_ref, bl_ref, o_ref):
    # xg_ref, c_ref: (TB, 256) tiles — the channel concat is folded into the
    # split first-layer weight so no concatenated tensor ever hits HBM.
    wdt = w2_ref.dtype
    h1 = jnp.maximum(
        jnp.dot(xg_ref[...], w1a_ref[...], preferred_element_type=jnp.float32)
        + jnp.dot(c_ref[...], w1b_ref[...], preferred_element_type=jnp.float32),
        0.0)                                                           # (TB, 128)
    h2 = jnp.maximum(
        jnp.dot(h1.astype(wdt), w2_ref[...],
                preferred_element_type=jnp.float32), 0.0)              # (TB, 64)
    h3 = jnp.maximum(
        jnp.dot(h2.astype(wdt), w3_ref[...],
                preferred_element_type=jnp.float32), 0.0)              # (TB, 32)
    # Final Linear(32 -> 1): VPU multiply + lane reduce (avoids pushing a
    # 1-column result through the MXU). Bias is a scalar read from SMEM.
    out = jnp.sum(h3 * wl_ref[...].astype(jnp.float32), axis=-1, keepdims=True)
    out = out + bl_ref[0]                                              # (TB, 1)
    o_ref[...] = out.astype(o_ref.dtype)


def _pick_tile(B, block_b):
    """Batch tile: full-extent single block for tiny B, otherwise >= 2 grid
    steps (v7x has 2 TensorCores) with tb a multiple of 8, capped at block_b."""
    if B <= min(block_b, 256):
        return B
    return max(8, min(block_b, _round_up(pl.cdiv(B, 2), 8)))


def globalinfoloss_forward(x_global, c, w1a, w1b, w2, w3, wl, bl, *,
                           block_b=2048):
    """x_global, c : (B, 256) float32 (or bfloat16).

    w1a, w1b : (256, 128)  -- c1.weight[:, :256, 0].T and c1.weight[:, 256:, 0].T
    w2       : (128, 64)   -- c2.weight[:, :, 0].T
    w3       : (64, 32)    -- c3.weight[:, :, 0].T
    wl       : (1, 32)     -- l0.weight (kept row-shaped)
    bl       : (1,)        -- l0.bias (any single-element shape accepted)
    Returns (B, 1) float32, matching the PyTorch forward.
    """
    B, ch = x_global.shape
    assert ch == C_HALF and c.shape == (B, C_HALF)
    bl = jnp.asarray(bl, jnp.float32).reshape((1,))   # scalar bias -> SMEM

    tb = _pick_tile(B, block_b)
    grid = (pl.cdiv(B, tb),)   # ragged final block: OOB rows read garbage,
                               # their outputs are masked out by Pallas.

    in_isz = jnp.dtype(x_global.dtype).itemsize
    w_isz = jnp.dtype(w1a.dtype).itemsize
    n_w = 2 * C_HALF * C_H1 + C_H1 * C_H2 + C_H2 * C_H3 + C_H3 + 1
    cost = pl.CostEstimate(
        flops=2 * B * (2 * C_HALF * C_H1 + C_H1 * C_H2 + C_H2 * C_H3 + C_H3),
        transcendentals=0,
        bytes_accessed=2 * B * C_HALF * in_isz + n_w * w_isz + B * 4,
    )

    # VMEM budget: 2 double-buffered input tiles + resident weights +
    # intermediates + output. Floor at 32 MiB (raises v5e's 16 MiB default,
    # matches v6e/v7x defaults), stay well under v7x's 64 MiB physical VMEM.
    vmem_est = (2 * 2 * tb * C_HALF * in_isz          # xg/c tiles, double-buffered
                + 2 * n_w * w_isz                     # weights
                + tb * (C_H1 + C_H2 + C_H3) * 4       # h1/h2/h3
                + 2 * tb * 4)                         # output tile
    vmem_limit = min(max(int(1.5 * vmem_est) + (2 << 20), 32 << 20), 56 << 20)

    out = pl.pallas_call(
        _globalinfo_kernel,
        out_shape=jax.ShapeDtypeStruct((B, 1), jnp.float32),
        grid_spec=pl.GridSpec(
            grid=grid,
            in_specs=[
                pl.BlockSpec((tb, C_HALF), lambda i: (i, 0)),     # x_global tile
                pl.BlockSpec((tb, C_HALF), lambda i: (i, 0)),     # c tile
                pl.BlockSpec((C_HALF, C_H1), lambda i: (0, 0)),   # w1a (resident)
                pl.BlockSpec((C_HALF, C_H1), lambda i: (0, 0)),   # w1b (resident)
                pl.BlockSpec((C_H1, C_H2), lambda i: (0, 0)),     # w2
                pl.BlockSpec((C_H2, C_H3), lambda i: (0, 0)),     # w3
                pl.BlockSpec((1, C_H3), lambda i: (0, 0)),        # l0 weight row
                pl.BlockSpec(memory_space=pltpu.MemorySpace.SMEM),  # l0 bias scalar
            ],
            out_specs=pl.BlockSpec((tb, 1), lambda i: (i, 0)),
        ),
        compiler_params=pltpu.CompilerParams(
            dimension_semantics=("parallel",),
            vmem_limit_bytes=vmem_limit),
        cost_estimate=cost,
    )(x_global, c, w1a, w1b, w2, w3, wl, bl)
    return out


def _reference(x_global, c, w1a, w1b, w2, w3, wl, bl):
    xx = jnp.concatenate([x_global, c], axis=1)                  # (B, 512)
    w1 = jnp.concatenate([w1a, w1b], axis=0)                     # (512, 128)
    h1 = jax.nn.relu(xx @ w1)
    h2 = jax.nn.relu(h1 @ w2)
    h3 = jax.nn.relu(h2 @ w3)
    return h3 @ wl.T + bl                                        # (B, 1)


if __name__ == "__main__":
    key = jax.random.PRNGKey(0)
    k_w1a, k_w1b, k_w2, k_w3, k_wl, k_bl, k_x = jax.random.split(key, 7)

    # PyTorch Conv1d weight (Cout, Cin, 1) -> squeeze(-1).T = (Cin, Cout);
    # c1's (128, 512, 1) weight is split along Cin into the x_global / c halves.
    w1a = jax.random.normal(k_w1a, (C_HALF, C_H1), jnp.float32) / jnp.sqrt(2.0 * C_HALF)
    w1b = jax.random.normal(k_w1b, (C_HALF, C_H1), jnp.float32) / jnp.sqrt(2.0 * C_HALF)
    w2 = jax.random.normal(k_w2, (C_H1, C_H2), jnp.float32) / jnp.sqrt(1.0 * C_H1)
    w3 = jax.random.normal(k_w3, (C_H2, C_H3), jnp.float32) / jnp.sqrt(1.0 * C_H2)
    # l0: Linear(32, 1) -> weight (1, 32) kept row-shaped, bias (1,).
    wl = jax.random.normal(k_wl, (1, C_H3), jnp.float32) / jnp.sqrt(1.0 * C_H3)
    bl = jax.random.normal(k_bl, (1,), jnp.float32) * 0.1

    def _check(B, block_b):
        kx, kc = jax.random.split(jax.random.fold_in(k_x, B))
        xg = jax.random.normal(kx, (B, C_HALF), jnp.float32)
        cc = jax.random.normal(kc, (B, C_HALF), jnp.float32)
        out = jax.block_until_ready(
            globalinfoloss_forward(xg, cc, w1a, w1b, w2, w3, wl, bl,
                                   block_b=block_b))
        ref = jax.block_until_ready(_reference(xg, cc, w1a, w1b, w2, w3, wl, bl))
        assert out.shape == (B, 1), out.shape
        err = float(jnp.max(jnp.abs(out - ref)))
        assert jnp.allclose(out, ref, atol=1e-4, rtol=1e-4), (B, err)

    _check(2, 2048)    # tiny batch: single full-extent block
    _check(22, 8)      # multi-step grid with a ragged final block (no padding)
    print("KERNEL_OK")
</pallas_src>

<mosaic_0001>
module attributes {stable_mosaic.version = 11 : i64} {
  func.func @_globalinfo_kernel(%arg0: i32, %arg1: memref<2x256xf32, #tpu.memory_space<vmem>>, %arg2: memref<2x256xf32, #tpu.memory_space<vmem>>, %arg3: memref<256x128xf32, #tpu.memory_space<vmem>>, %arg4: memref<256x128xf32, #tpu.memory_space<vmem>>, %arg5: memref<128x64xf32, #tpu.memory_space<vmem>>, %arg6: memref<64x32xf32, #tpu.memory_space<vmem>>, %arg7: memref<1x32xf32, #tpu.memory_space<vmem>>, %arg8: memref<1xf32, #tpu.memory_space<smem>>, %arg9: memref<2x1xf32, #tpu.memory_space<vmem>>) attributes {dimension_semantics = [#tpu.dimension_semantics<parallel>], iteration_bounds = array<i64: 1>, scalar_prefetch = 0 : i64, scratch_operands = 0 : i64, tpu.core_type = #tpu.core_type<tc>, window_params = [{transform_indices = @transform_0, window_bounds = array<i64: 2, 256>}, {transform_indices = @transform_1, window_bounds = array<i64: 2, 256>}, {pipeline_mode = #tpu.pipeline_mode<synchronous>, transform_indices = @transform_2, window_bounds = array<i64: 256, 128>}, {pipeline_mode = #tpu.pipeline_mode<synchronous>, transform_indices = @transform_3, window_bounds = array<i64: 256, 128>}, {pipeline_mode = #tpu.pipeline_mode<synchronous>, transform_indices = @transform_4, window_bounds = array<i64: 128, 64>}, {pipeline_mode = #tpu.pipeline_mode<synchronous>, transform_indices = @transform_5, window_bounds = array<i64: 64, 32>}, {pipeline_mode = #tpu.pipeline_mode<synchronous>, transform_indices = @transform_6, window_bounds = array<i64: 1, 32>}, {transform_indices = @transform_7, window_bounds = array<i64: 1>}, {transform_indices = @transform_8, window_bounds = array<i64: 2, 1>}]} {
    %c0 = arith.constant 0 : index
    %c0_0 = arith.constant 0 : index
    %0 = vector.load %arg1[%c0, %c0_0] : memref<2x256xf32, #tpu.memory_space<vmem>>, vector<2x256xf32>
    %c0_1 = arith.constant 0 : index
    %c0_2 = arith.constant 0 : index
    %1 = vector.load %arg3[%c0_1, %c0_2] : memref<256x128xf32, #tpu.memory_space<vmem>>, vector<256x128xf32>
    %cst = arith.constant dense<0.000000e+00> : vector<2x128xf32>
    %2 = tpu.matmul %0, %1, %cst {dimension_numbers = #tpu.dot_dimension_numbers<[1], [0], [0], [1], [0, 0, 1, 1], [], []>} : vector<2x256xf32>, vector<256x128xf32>, vector<2x128xf32> -> vector<2x128xf32>
    %c0_3 = arith.constant 0 : index
    %c0_4 = arith.constant 0 : index
    %3 = vector.load %arg2[%c0_3, %c0_4] : memref<2x256xf32, #tpu.memory_space<vmem>>, vector<2x256xf32>
    %c0_5 = arith.constant 0 : index
    %c0_6 = arith.constant 0 : index
    %4 = vector.load %arg4[%c0_5, %c0_6] : memref<256x128xf32, #tpu.memory_space<vmem>>, vector<256x128xf32>
    %cst_7 = arith.constant dense<0.000000e+00> : vector<2x128xf32>
    %5 = tpu.matmul %3, %4, %cst_7 {dimension_numbers = #tpu.dot_dimension_numbers<[1], [0], [0], [1], [0, 0, 1, 1], [], []>} : vector<2x256xf32>, vector<256x128xf32>, vector<2x128xf32> -> vector<2x128xf32>
    %6 = arith.addf %2, %5 : vector<2x128xf32>
    %cst_8 = arith.constant 0.000000e+00 : f32
    %7 = vector.broadcast %cst_8 : f32 to vector<2x128xf32>
    %8 = arith.maximumf %6, %7 : vector<2x128xf32>
    %c0_9 = arith.constant 0 : index
    %c0_10 = arith.constant 0 : index
    %9 = vector.load %arg5[%c0_9, %c0_10] : memref<128x64xf32, #tpu.memory_space<vmem>>, vector<128x64xf32>
    %cst_11 = arith.constant dense<0.000000e+00> : vector<2x64xf32>
    %10 = tpu.matmul %8, %9, %cst_11 {dimension_numbers = #tpu.dot_dimension_numbers<[1], [0], [0], [1], [0, 0, 1, 1], [], []>} : vector<2x128xf32>, vector<128x64xf32>, vector<2x64xf32> -> vector<2x64xf32>
    %cst_12 = arith.constant 0.000000e+00 : f32
    %11 = vector.broadcast %cst_12 : f32 to vector<2x64xf32>
    %12 = arith.maximumf %10, %11 : vector<2x64xf32>
    %c0_13 = arith.constant 0 : index
    %c0_14 = arith.constant 0 : index
    %13 = vector.load %arg6[%c0_13, %c0_14] : memref<64x32xf32, #tpu.memory_space<vmem>>, vector<64x32xf32>
    %cst_15 = arith.constant dense<0.000000e+00> : vector<2x32xf32>
    %14 = tpu.matmul %12, %13, %cst_15 {dimension_numbers = #tpu.dot_dimension_numbers<[1], [0], [0], [1], [0, 0, 1, 1], [], []>} : vector<2x64xf32>, vector<64x32xf32>, vector<2x32xf32> -> vector<2x32xf32>
    %cst_16 = arith.constant 0.000000e+00 : f32
    %15 = vector.broadcast %cst_16 : f32 to vector<2x32xf32>
    %16 = arith.maximumf %14, %15 : vector<2x32xf32>
    %c0_17 = arith.constant 0 : index
    %c0_18 = arith.constant 0 : index
    %17 = vector.load %arg7[%c0_17, %c0_18] : memref<1x32xf32, #tpu.memory_space<vmem>>, vector<1x32xf32>
    %18 = vector.broadcast %17 : vector<1x32xf32> to vector<2x32xf32>
    %19 = arith.mulf %16, %18 : vector<2x32xf32>
    %cst_19 = arith.constant dense<0.000000e+00> : vector<2xf32>
    %20 = vector.multi_reduction <add>, %19, %cst_19 [1] : vector<2x32xf32> to vector<2xf32>
    %21 = vector.shape_cast %20 : vector<2xf32> to vector<2x1xf32>
    %c0_20 = arith.constant 0 : index
    %22 = memref.load %arg8[%c0_20] : memref<1xf32, #tpu.memory_space<smem>>
    %23 = vector.broadcast %22 : f32 to vector<2x1xf32>
    %24 = arith.addf %21, %23 : vector<2x1xf32>
    %c0_21 = arith.constant 0 : index
    %c0_22 = arith.constant 0 : index
    %25 = vector.load %arg9[%c0_21, %c0_22] : memref<2x1xf32, #tpu.memory_space<vmem>>, vector<2x1xf32>
    tpu.vector_store %arg9[%c0_21, %c0_22], %24 {strides = array<i32>} : memref<2x1xf32, #tpu.memory_space<vmem>>, vector<2x1xf32>,
    return
  }
  func.func @transform_0(%arg0: i32) -> (i32, i32) {
    %c0_i32 = arith.constant 0 : i32
    %c0_i32_0 = arith.constant 0 : i32
    return %arg0, %c0_i32 : i32, i32
  }
  func.func @transform_1(%arg0: i32) -> (i32, i32) {
    %c0_i32 = arith.constant 0 : i32
    %c0_i32_0 = arith.constant 0 : i32
    return %arg0, %c0_i32 : i32, i32
  }
  func.func @transform_2(%arg0: i32) -> (i32, i32) {
    %c0_i32 = arith.constant 0 : i32
    %c0_i32_0 = arith.constant 0 : i32
    %c0_i32_1 = arith.constant 0 : i32
    return %c0_i32, %c0_i32_0 : i32, i32
  }
  func.func @transform_3(%arg0: i32) -> (i32, i32) {
    %c0_i32 = arith.constant 0 : i32
    %c0_i32_0 = arith.constant 0 : i32
    %c0_i32_1 = arith.constant 0 : i32
    return %c0_i32, %c0_i32_0 : i32, i32
  }
  func.func @transform_4(%arg0: i32) -> (i32, i32) {
    %c0_i32 = arith.constant 0 : i32
    %c0_i32_0 = arith.constant 0 : i32
    %c0_i32_1 = arith.constant 0 : i32
    return %c0_i32, %c0_i32_0 : i32, i32
  }
  func.func @transform_5(%arg0: i32) -> (i32, i32) {
    %c0_i32 = arith.constant 0 : i32
    %c0_i32_0 = arith.constant 0 : i32
    %c0_i32_1 = arith.constant 0 : i32
    return %c0_i32, %c0_i32_0 : i32, i32
  }
  func.func @transform_6(%arg0: i32) -> (i32, i32) {
    %c0_i32 = arith.constant 0 : i32
    %c0_i32_0 = arith.constant 0 : i32
    %c0_i32_1 = arith.constant 0 : i32
    return %c0_i32, %c0_i32_0 : i32, i32
  }
  func.func @transform_7(%arg0: i32) -> i32 {
    %c0_i32 = arith.constant 0 : i32
    %c0_i32_0 = arith.constant 0 : i32
    return %c0_i32 : i32
  }
  func.func @transform_8(%arg0: i32) -> (i32, i32) {
    %c0_i32 = arith.constant 0 : i32
    %c0_i32_0 = arith.constant 0 : i32
    return %arg0, %c0_i32 : i32, i32
  }
}

</mosaic_0001>

<bundles_post_ra>
// kernel: tpu_custom_call.1
= control target key start
LH: loop header
LB: loop body
LE: loop exit
PB: predicated region body
PF: predicated region fallthrough
CT: control target
= control target key end

     0   :  { %14 = vsyncpa [#allocation4], 0  ;;  %s325_s30 = smov [#allocation3]   ;;  %s326_s10 = smov 128   ;;  %s559_s0 = inlined_call_operand.vmem [shape: f32[2,256], index: 0, kind: input, shape index: {}]   ;;  %s560_s1 = inlined_call_operand.vmem [shape: f32[2,256], index: 1, kind: input, shape index: {}]   ;;  %s561_s2 = inlined_call_operand.vmem [shape: f32[256,128], index: 2, kind: input, shape index: {}]   ;;  %s562_s3 = inlined_call_operand.hbm [shape: f32[256,128], index: 3, kind: input, shape index: {}]   ;;  %s563_s4 = inlined_call_operand.vmem [shape: f32[128,64], index: 4, kind: input, shape index: {}]   ;;  %s564_s5 = inlined_call_operand.vmem [shape: f32[64,32], index: 5, kind: input, shape index: {}]   ;;  %s565_s6 = inlined_call_operand.vmem [shape: f32[1,32], index: 6, kind: input, shape index: {}]   ;;  %s566_s7 = inlined_call_operand.<no memory space> [shape: f32[1], index: 7, kind: input, shape index: {}]   ;;  %s567_s8 = inlined_call_operand.vmem [shape: f32[2,1], index: 8, kind: output, shape index: {}]  }
   0x1   :  { %s25_s29 = sshll.u32 %s562_s3, 4  ;;  %s27_s9 = sshll.u32 %s325_s30, 4  ;;  %s26_s29 = int_to_ptr.hbm [resolvable:$true] %s25_s29  ;;  %s28_s9 = int_to_ptr.vmem [resolvable:$true] %s27_s9 }
   0x2   :  { %s327_s11 = smov 8  }
   0x3   :  { %33 = dma.hbm_to_vmem [thread:$0]  %s26_s29, 4096, %s28_s9, [#allocation4], %s326_s10, %s326_s10, %s327_s11  }
   0x4   :  { %323 = dma.done.wait [#allocation4], 4096  }
   0x5   :  { %324 = vsyncadd [#allocation4], 4294963200  ;;  %v62_v0 = vld [vmem:[%s561_s2 + $0x78] sm:$0xff]  ;;  %v61_v1 = vld [vmem:[%s561_s2 + $0x70] sm:$0xff]  ;;  %vm250_vm0 = vcmask 523264   ;;  %vm280_vm1 = vcmask 254976  }
   0x6   :  { %v78_v2 = vld [vmem:[%s561_s2 + $0xf8] sm:$0xff]  ;;  %164 = vmatpush.msra.mxu2 %v62_v0  ;;  %v95_v3 = vld [vmem:[#allocation3 + $0x78] sm:$0xff]  ;;  %v60_v5 = vld [vmem:[%s561_s2 + $0x68] sm:$0xff]  ;;  %vm287_vm2 = vcmask 1024  }
   0x7   :  { %184 = vmatpush.msra.mxu3 %v78_v2  ;;  %v111_v4 = vld [vmem:[#allocation3 + $0xf8] sm:$0xff]  ;;  %118 = vmatpush.msra.mxu0 %v95_v3  ;;  %v77_v6 = vld [vmem:[%s561_s2 + $0xf0] sm:$0xff]  ;;  %v94_v7 = vld [vmem:[#allocation3 + $0x70] sm:$0xff] }
   0x8   :  { %138 = vmatpush.msra.mxu1 %v111_v4  ;;  %v110_v8 = vld [vmem:[#allocation3 + $0xf0] sm:$0xff]  ;;  %165 = vmatpush.msra.mxu2 %v61_v1  ;;  %v76_v9 = vld [vmem:[%s561_s2 + $0xe8] sm:$0xff]  ;;  %v93_v10 = vld [vmem:[#allocation3 + $0x68] sm:$0xff] }
   0x9   :  { %185 = vmatpush.msra.mxu3 %v77_v6  ;;  %119 = vmatpush.msra.mxu0 %v94_v7  ;;  %v59_v11 = vld [vmem:[%s561_s2 + $0x60] sm:$0xff]  ;;  %v109_v12 = vld [vmem:[#allocation3 + $0xe8] sm:$0xff]  ;;  %v92_v14 = vld [vmem:[#allocation3 + $0x60] sm:$0xff] }
   0xa   :  { %139 = vmatpush.msra.mxu1 %v110_v8  ;;  %v75_v13 = vld [vmem:[%s561_s2 + $0xe0] sm:$0xff]  ;;  %166 = vmatpush.msra.mxu2 %v60_v5  ;;  %v108_v15 = vld [vmem:[#allocation3 + $0xe0] sm:$0xff]  ;;  %v58_v16 = vld [vmem:[%s561_s2 + $0x58] sm:$0xff] }
   0xb   :  { %186 = vmatpush.msra.mxu3 %v76_v9  ;;  %120 = vmatpush.msra.mxu0 %v93_v10  ;;  %v74_v17 = vld [vmem:[%s561_s2 + $0xd8] sm:$0xff]  ;;  %v91_v18 = vld [vmem:[#allocation3 + $0x58] sm:$0xff]  ;;  %v57_v20 = vld [vmem:[%s561_s2 + $0x50] sm:$0xff] }
   0xc   :  { %140 = vmatpush.msra.mxu1 %v109_v12  ;;  %167 = vmatpush.msra.mxu2 %v59_v11  ;;  %v107_v19 = vld [vmem:[#allocation3 + $0xd8] sm:$0xff]  ;;  %v73_v21 = vld [vmem:[%s561_s2 + $0xd0] sm:$0xff]  ;;  %v90_v22 = vld [vmem:[#allocation3 + $0x50] sm:$0xff] }
   0xd   :  { %187 = vmatpush.msra.mxu3 %v75_v13  ;;  %121 = vmatpush.msra.mxu0 %v92_v14  ;;  %v106_v23 = vld [vmem:[#allocation3 + $0xd0] sm:$0xff]  ;;  %v56_v24 = vld [vmem:[%s561_s2 + $0x48] sm:$0xff]  ;;  %v89_v26 = vld [vmem:[#allocation3 + $0x48] sm:$0xff] }
   0xe   :  { %141 = vmatpush.msra.mxu1 %v108_v15  ;;  %168 = vmatpush.msra.mxu2 %v58_v16  ;;  %v72_v25 = vld [vmem:[%s561_s2 + $0xc8] sm:$0xff]  ;;  %v105_v27 = vld [vmem:[#allocation3 + $0xc8] sm:$0xff]  ;;  %v55_v28 = vld [vmem:[%s561_s2 + $0x40] sm:$0xff] }
   0xf   :  { %188 = vmatpush.msra.mxu3 %v74_v17  ;;  %122 = vmatpush.msra.mxu0 %v91_v18  ;;  %v71_v29 = vld [vmem:[%s561_s2 + $0xc0] sm:$0xff]  ;;  %v88_v30 = vld [vmem:[#allocation3 + $0x40] sm:$0xff]  ;;  %v54_v32 = vld [vmem:[%s561_s2 + $0x38] sm:$0xff] }
  0x10   :  { %142 = vmatpush.msra.mxu1 %v107_v19  ;;  %169 = vmatpush.msra.mxu2 %v57_v20  ;;  %v104_v31 = vld [vmem:[#allocation3 + $0xc0] sm:$0xff]  ;;  %v70_v33 = vld [vmem:[%s561_s2 + $0xb8] sm:$0xff]  ;;  %v87_v34 = vld [vmem:[#allocation3 + $0x38] sm:$0xff] }
  0x11   :  { %189 = vmatpush.msra.mxu3 %v73_v21  ;;  %123 = vmatpush.msra.mxu0 %v90_v22  ;;  %v103_v35 = vld [vmem:[#allocation3 + $0xb8] sm:$0xff]  ;;  %v53_v36 = vld [vmem:[%s561_s2 + $0x30] sm:$0xff]  ;;  %v86_v38 = vld [vmem:[#allocation3 + $0x30] sm:$0xff] }
  0x12   :  { %143 = vmatpush.msra.mxu1 %v106_v23  ;;  %170 = vmatpush.msra.mxu2 %v56_v24  ;;  %v69_v37 = vld [vmem:[%s561_s2 + $0xb0] sm:$0xff]  ;;  %v102_v39 = vld [vmem:[#allocation3 + $0xb0] sm:$0xff]  ;;  %v52_v40 = vld [vmem:[%s561_s2 + $0x28] sm:$0xff] }
  0x13   :  { %190 = vmatpush.msra.mxu3 %v72_v25  ;;  %124 = vmatpush.msra.mxu0 %v89_v26  ;;  %v68_v41 = vld [vmem:[%s561_s2 + $0xa8] sm:$0xff]  ;;  %v85_v42 = vld [vmem:[#allocation3 + $0x28] sm:$0xff]  ;;  %v51_v44 = vld [vmem:[%s561_s2 + $0x20] sm:$0xff] }
  0x14   :  { %144 = vmatpush.msra.mxu1 %v105_v27  ;;  %171 = vmatpush.msra.mxu2 %v55_v28  ;;  %v101_v43 = vld [vmem:[#allocation3 + $0xa8] sm:$0xff]  ;;  %v67_v45 = vld [vmem:[%s561_s2 + $0xa0] sm:$0xff]  ;;  %v84_v47 = vld [vmem:[#allocation3 + $0x20] sm:$0xff] }
  0x15   :  { %191 = vmatpush.msra.mxu3 %v71_v29  ;;  %125 = vmatpush.msra.mxu0 %v88_v30  ;;  %v79_v46 = vld [vmem:[%s560_s1] sm:$0xf]  ;;  %v100_v48 = vld [vmem:[#allocation3 + $0xa0] sm:$0xff]  ;;  %v50_v49 = vld [vmem:[%s561_s2 + $0x18] sm:$0xff] }
  0x16   :  { %145 = vmatpush.msra.mxu1 %v104_v31  ;;  %172 = vmatpush.msra.mxu2 %v54_v32  ;;  %113 = vst [vmem:[#allocation1] ss:$4 sm:$0xff] %v79_v46  ;;  %v66_v50 = vld [vmem:[%s561_s2 + $0x98] sm:$0xff]  ;;  %v83_v51 = vld [vmem:[#allocation3 + $0x18] sm:$0xff]  ;;  %v49_v53 = vld [vmem:[%s561_s2 + $0x10] sm:$0xff] }
  0x17   :  { %192 = vmatpush.msra.mxu3 %v70_v33  ;;  %126 = vmatpush.msra.mxu0 %v87_v34  ;;  %v99_v52 = vld [vmem:[#allocation3 + $0x98] sm:$0xff]  ;;  %v48_v54 = vld [vmem:[%s561_s2 + $0x8] sm:$0xff]  ;;  %v65_v55 = vld [vmem:[%s561_s2 + $0x90] sm:$0xff] }
  0x18   :  { %146 = vmatpush.msra.mxu1 %v103_v35  ;;  %173 = vmatpush.msra.mxu2 %v53_v36  ;;  %v82_v56 = vld [vmem:[#allocation3 + $0x10] sm:$0xff]  ;;  %v47_v58 = vld [vmem:[%s561_s2] sm:$0xff]  ;;  %v64_v59 = vld [vmem:[%s561_s2 + $0x88] sm:$0xff] }
  0x19   :  { %193 = vmatpush.msra.mxu3 %v69_v37  ;;  %127 = vmatpush.msra.mxu0 %v86_v38  ;;  %v98_v57 = vld [vmem:[#allocation3 + $0x90] sm:$0xff]  ;;  %v46_v60 = vld [vmem:[%s559_s0] sm:$0xf]  ;;  %v81_v61 = vld [vmem:[#allocation3 + $0x8] sm:$0xff] }
  0x1a   :  { %147 = vmatpush.msra.mxu1 %v102_v39  ;;  %174 = vmatpush.msra.mxu2 %v52_v40  ;;  %v97_v62 = vld [vmem:[#allocation3 + $0x88] sm:$0xff]  ;;  %v63_v63 = vld [vmem:[%s561_s2 + $0x80] sm:$0xff]  ;;  %v80_v2 = vld [vmem:[#allocation3] sm:$0xff] }
  0x1b   :  { %194 = vmatpush.msra.mxu3 %v68_v41  ;;  %128 = vmatpush.msra.mxu0 %v85_v42  ;;  %v96_v3 = vld [vmem:[#allocation3 + $0x80] sm:$0xff]  ;;  %v220_v4 = vld [vmem:[%s563_s4 + $0x78] sm:$0xff]  ;;  %v219_v5 = vld [vmem:[%s563_s4 + $0x70] sm:$0xff] }
  0x1c   :  { %148 = vmatpush.msra.mxu1 %v101_v43  ;;  %175 = vmatpush.msra.mxu2 %v51_v44  ;;  %v218_v6 = vld [vmem:[%s563_s4 + $0x68] sm:$0xff]  ;;  %v217_v9 = vld [vmem:[%s563_s4 + $0x60] sm:$0xff]  ;;  %v216_v10 = vld [vmem:[%s563_s4 + $0x58] sm:$0xff] }
  0x1d   :  { %195 = vmatpush.msra.mxu3 %v67_v45  ;;  %129 = vmatpush.msra.mxu0 %v84_v47  ;;  %v114_v0 = vld.sshfl [vmem:[#allocation1] sm:$0xff pattern:$0x73625140]  ;;  %v115_v1 = vld.sshfl [vmem:[#allocation1 + $0x8] sm:$0xff pattern:$0x73625140]  ;;  %v285_v45 = vstv %s566_s7 }
  0x1e   :  { %149 = vmatpush.msra.mxu1 %v100_v48  ;;  %176 = vmatpush.msra.mxu2 %v50_v49  ;;  %159 = vst [vmem:[#allocation1] ss:$4 sm:$0xff] %v46_v60  ;;  %v215_v11 = vld [vmem:[%s563_s4 + $0x50] sm:$0xff]  ;;  %v214_v12 = vld [vmem:[%s563_s4 + $0x48] sm:$0xff]  ;;  %v213_v13 = vld [vmem:[%s563_s4 + $0x40] sm:$0xff] }
  0x1f   :  { %196 = vmatpush.msra.mxu3 %v66_v50  ;;  %130 = vmatpush.msra.mxu0 %v83_v51  ;;  %v212_v14 = vld [vmem:[%s563_s4 + $0x38] sm:$0xff]  ;;  %v211_v15 = vld [vmem:[%s563_s4 + $0x30] sm:$0xff]  ;;  %v210_v16 = vld [vmem:[%s563_s4 + $0x28] sm:$0xff] }
  0x20   :  { %150 = vmatpush.msra.mxu1 %v99_v52  ;;  %177 = vmatpush.msra.mxu2 %v49_v53  ;;  %v209_v17 = vld [vmem:[%s563_s4 + $0x20] sm:$0xff]  ;;  %v208_v18 = vld [vmem:[%s563_s4 + $0x18] sm:$0xff]  ;;  %v207_v19 = vld [vmem:[%s563_s4 + $0x10] sm:$0xff] }
  0x21   :  { %197 = vmatpush.msra.mxu3 %v65_v55  ;;  %131 = vmatpush.msra.mxu0 %v82_v56  ;;  %v206_v20 = vld [vmem:[%s563_s4 + $0x8] sm:$0xff]  ;;  %v205_v21 = vld [vmem:[%s563_s4] sm:$0xff]  ;;  %v249_v22 = vld [vmem:[%s564_s5 + $0x38] sm:$0xff] }
  0x22   :  { %151 = vmatpush.msra.mxu1 %v98_v57  ;;  %178 = vmatpush.msra.mxu2 %v48_v54  ;;  %v248_v23 = vld [vmem:[%s564_s5 + $0x30] sm:$0xff]  ;;  %v247_v24 = vld [vmem:[%s564_s5 + $0x28] sm:$0xff]  ;;  %v246_v25 = vld [vmem:[%s564_s5 + $0x20] sm:$0xff] }
  0x23   :  { %198 = vmatpush.msra.mxu3 %v64_v59  ;;  %132 = vmatpush.msra.mxu0 %v81_v61  ;;  %v245_v26 = vld [vmem:[%s564_s5 + $0x18] sm:$0xff]  ;;  %v244_v27 = vld [vmem:[%s564_s5 + $0x10] sm:$0xff]  ;;  %v243_v36 = vld [vmem:[%s564_s5 + $0x8] sm:$0xff] }
  0x24   :  { %152 = vmatpush.msra.mxu1 %v97_v62  ;;  %179 = vmatpush.msra.mxu2 %v47_v58  ;;  %v242_v37 = vld [vmem:[%s564_s5] sm:$0xff] }
  0x25   :  { %199 = vmatpush.msra.mxu3 %v63_v63  ;;  %133 = vmatpush.msra.mxu0 %v80_v2  ;;  %v160_v7 = vld.sshfl [vmem:[#allocation1] sm:$0xff pattern:$0x73625140]  ;;  %v161_v8 = vld.sshfl [vmem:[#allocation1 + $0x8] sm:$0xff pattern:$0x73625140] }
  0x26   :  { %153 = vmatpush.msra.mxu1 %v96_v3  ;;  %134 = vmatmul.f32.vlgmr.msra.gmra.mxu0 %v114_v0  ;;  %v298_v40 = vld [vmem:[%s565_s6] ss:$0 sm:$0xff] }
  0x27   :  { %154 = vmatmul.f32.vlgmr.msra.gmra.mxu1 %v115_v1  ;;  %221 = vmatpush.msrb.mxu0 %v220_v4 }
  0x28   :  { %180 = vmatmul.f32.vlgmr.msra.gmra.mxu2 %v160_v7  ;;  %200 = vmatmul.f32.vlgmr.msra.gmra.mxu3 %v161_v8 }
  0x29   :  { %222 = vmatpush.msrb.mxu0 %v219_v5  ;;  %262 = vmatpush.msrb.mxu1 %v249_v22 }
  0x2b   :  { %223 = vmatpush.msrb.mxu0 %v218_v6  ;;  %263 = vmatpush.msrb.mxu1 %v248_v23 }
  0x2d   :  { %224 = vmatpush.msrb.mxu0 %v217_v9  ;;  %264 = vmatpush.msrb.mxu1 %v247_v24 }
  0x2f   :  { %225 = vmatpush.msrb.mxu0 %v216_v10  ;;  %265 = vmatpush.msrb.mxu1 %v246_v25 }
  0x31   :  { %226 = vmatpush.msrb.mxu0 %v215_v11  ;;  %266 = vmatpush.msrb.mxu1 %v245_v26 }
  0x33   :  { %227 = vmatpush.msrb.mxu0 %v214_v12  ;;  %267 = vmatpush.msrb.mxu1 %v244_v27 }
  0x35   :  { %228 = vmatpush.msrb.mxu0 %v213_v13  ;;  %268 = vmatpush.msrb.mxu1 %v243_v36 }
  0x37   :  { %229 = vmatpush.msrb.mxu0 %v212_v14  ;;  %269 = vmatpush.msrb.mxu1 %v242_v37 }
  0x39   :  { %230 = vmatpush.msrb.mxu0 %v211_v15 }
  0x3b   :  { %231 = vmatpush.msrb.mxu0 %v210_v16 }
  0x3d   :  { %232 = vmatpush.msrb.mxu0 %v209_v17 }
  0x3f   :  { %233 = vmatpush.msrb.mxu0 %v208_v18 }
  0x41   :  { %234 = vmatpush.msrb.mxu0 %v207_v19 }
  0x43   :  { %235 = vmatpush.msrb.mxu0 %v206_v20 }
  0x45   :  { %236 = vmatpush.msrb.mxu0 %v205_v21 }
  0xa3   :  { %v135_v28 = vpop.f32.mrf.mxu0 }
  0xa4   :  { %v155_v29 = vpop.f32.mrf.mxu1 }
  0xa5   :  { %v156_v30 = vadd.f32 %v155_v29, %v135_v28 }
  0xab   :  { %v181_v31 = vpop.f32.mrf.mxu2  ;;  %v201_v32 = vpop.f32.mrf.mxu3 }
  0xac   :  { %v182_v33 = vadd.f32 %v181_v31, %v156_v30 }
  0xae   :  { %v202_v34 = vadd.f32 %v201_v32, %v182_v33 }
  0xb0   :  { %v204_v35 = vmax.f32 %v202_v34, 0.0 }
  0xb2   :  { %237 = vmatmul.f32.vlgmr.msrb.gmra.mxu0 %v204_v35 }
 0x12f   :  { %v238_v38 = vpop.f32.mrf.mxu0 }
 0x130   :  { %v241_v39 = vmax.f32 %v238_v38, 0.0 }
 0x132   :  { %294 = vmatmul.msk.f32.vlgmr.msrb.gmra.mxu1 %vm250_vm0, %v241_v39 }
 0x1af   :  { %v271_v41 = vpop.f32.mrf.mxu1 }
 0x1b0   :  { %v274_v42 = vmax.f32 %v271_v41, 0.0 }
 0x1b2   :  { %v279_v43 = vmul.f32 %v298_v40, %v274_v42 }
 0x1b4   :  { %v281_v44 = vsel %vm280_vm1, %v279_v43, 0.0 }
 0x1b5   :  { %282 = vadd.xlane.f32.xlu0 %v281_v44 }
 0x228   :  { %v283_v46 = vpop.xlane.xlu0 %282 }
 0x229   :  { %v286_v47 = vadd.f32 %v285_v45, %v283_v46 }
 0x22b   :  { %288 = vst.msk [vmem:[%s567_s8] sm:$0x3] %vm287_vm2, %v286_v47 }
 0x22c   :  { %293 = vsyncpa [#allocation4], 1 }

</bundles_post_ra>
